<compile_context>
chip_gen: v7x
topology: tpu7x:2x2x1
jax: 0.10.0
libtpu: 0.0.40
codegen_flags: <defaults>
</compile_context>

<pallas_src>
import jax
import jax.numpy as jnp
from jax.experimental import pallas as pl
from jax.experimental.pallas import tpu as pltpu


def _sigmoid_kernel(x_ref, o_ref):
    # sigmoid(x) = 0.5 * (1 + tanh(x / 2)) — single EUP transcendental.
    x = x_ref[...]
    o_ref[...] = 0.5 * jnp.tanh(0.5 * x) + 0.5


def _best_slab_shape(total: int) -> tuple:
    """Pick a lane-packed 2D shape (rows, cols) for `total` elements.

    Prefers 8 sublane rows so the data occupies as few vregs as possible;
    falls back to fewer rows when `total` is not divisible by 8.
    """
    for rows in (8, 4, 2, 1):
        if total % rows == 0:
            return (rows, total // rows)
    return (1, total)


def sigmoid_pallas(x_nchw: jax.Array) -> jax.Array:
    """Applies sigmoid to an NCHW tensor using a gridless Pallas TPU kernel."""
    orig_shape = x_nchw.shape
    total = 1
    for d in orig_shape:
        total *= d

    # Elementwise op — NCHW order is irrelevant.  Present a lane-packed slab
    # (for [1,960,1,1] this is (8, 120): one vreg region, no padding needed).
    slab = x_nchw.reshape(_best_slab_shape(total))

    out_slab = pl.pallas_call(
        _sigmoid_kernel,
        out_shape=jax.ShapeDtypeStruct(slab.shape, slab.dtype),
        in_specs=[pl.BlockSpec(memory_space=pltpu.MemorySpace.VMEM)],
        out_specs=pl.BlockSpec(memory_space=pltpu.MemorySpace.VMEM),
    )(slab)

    return out_slab.reshape(orig_shape)


if __name__ == "__main__":
    key = jax.random.PRNGKey(0)
    # Shape matches the module's forward: [1, 960, 1, 1] (NCHW).
    x = jax.random.normal(key, (1, 960, 1, 1), dtype=jnp.float32)

    y = sigmoid_pallas(x)
    y = jax.block_until_ready(y)

    # Sanity check against plain-JAX reference.
    ref = jax.nn.sigmoid(x)
    assert y.shape == x.shape
    assert jnp.allclose(y, ref, atol=1e-6), "mismatch vs reference sigmoid"

    print("KERNEL_OK")
</pallas_src>

<mosaic_0001>
module attributes {stable_mosaic.version = 11 : i64} {
  func.func @_sigmoid_kernel(%arg0: memref<8x120xf32, #tpu.memory_space<vmem>>, %arg1: memref<8x120xf32, #tpu.memory_space<vmem>>) attributes {dimension_semantics = [], scalar_prefetch = 0 : i64, scratch_operands = 0 : i64, tpu.core_type = #tpu.core_type<tc>} {
    %c0 = arith.constant 0 : index
    %c0_0 = arith.constant 0 : index
    %0 = vector.load %arg0[%c0, %c0_0] : memref<8x120xf32, #tpu.memory_space<vmem>>, vector<8x120xf32>
    %cst = arith.constant 5.000000e-01 : f32
    %1 = vector.broadcast %cst : f32 to vector<8x120xf32>
    %2 = arith.mulf %1, %0 : vector<8x120xf32>
    %3 = math.tanh %2 : vector<8x120xf32>
    %cst_1 = arith.constant 5.000000e-01 : f32
    %4 = vector.broadcast %cst_1 : f32 to vector<8x120xf32>
    %5 = arith.mulf %4, %3 : vector<8x120xf32>
    %cst_2 = arith.constant 5.000000e-01 : f32
    %6 = vector.broadcast %cst_2 : f32 to vector<8x120xf32>
    %7 = arith.addf %5, %6 : vector<8x120xf32>
    %c0_3 = arith.constant 0 : index
    %c0_4 = arith.constant 0 : index
    %8 = vector.load %arg1[%c0_3, %c0_4] : memref<8x120xf32, #tpu.memory_space<vmem>>, vector<8x120xf32>
    tpu.vector_store %arg1[%c0_3, %c0_4], %7 {strides = array<i32>} : memref<8x120xf32, #tpu.memory_space<vmem>>, vector<8x120xf32>,
    return
  }
}

</mosaic_0001>

<bundles_post_ra>
// kernel: tpu_custom_call.1
= control target key start
LH: loop header
LB: loop body
LE: loop exit
PB: predicated region body
PF: predicated region fallthrough
CT: control target
= control target key end

     0   :  { %6 = vsyncpa [#allocation3], 0  ;;  %s131_s0 = inlined_call_operand.hbm [shape: f32[8,120], index: 0, kind: input, shape index: {}]   ;;  %s132_s1 = inlined_call_operand.hbm [shape: f32[8,120], index: 1, kind: output, shape index: {}]  }
   0x1   :  { %7 = vsyncpa [#allocation4], 0  ;;  %s95_s6 = smov [#allocation2]   ;;  %s47_s10 = scalar_lea.hbm %s131_s0, 128 }
   0x2   :  { %s14_s7 = sshll.u32 %s95_s6, 4  ;;  %p48_p0 = scmp.ne.s32.totalorder %s131_s0, %s47_s10  ;;  %s15_s7 = int_to_ptr.vmem [resolvable:$true] %s14_s7 }
   0x3   :  { %p51_p1 = scmp.lt.u32.totalorder %s47_s10, %s131_s0 }
   0x5   :  { %p53_p2 = pnand %p51_p1, %p48_p0 }
   0x7   :  { %56 = shalt.err (!%p53_p2)
}
   0x8   :  { %s57_s15 = scalar_lea.vmem %s15_s7, 128  ;;  %p62_p4 = scmp.lt.s32.totalorder %s15_s7, %s15_s7 }
   0x9   :  { %p58_p3 = scmp.ne.s32.totalorder %s15_s7, %s57_s15  ;;  %p63_p5 = scmp.lt.s32.totalorder %s57_s15, %s57_s15 }
   0xb   :  { %p64_p6 = por %p63_p5, %p62_p4 }
   0xd   :  { %p65_p7 = pnand %p64_p6, %p58_p3 }
   0xf   :  { %68 = shalt.err (!%p65_p7)
}
  0x10   :  { %17 = dma.hbm_to_vmem [thread:$0]  %s131_s0, 128, %s15_s7, [#allocation3]  }
  0x11   :  { %91 = dma.done.wait [#allocation3], 128  }
  0x12   :  { %92 = vsyncadd [#allocation3], 4294967168  ;;  %v21_v0 = vld [vmem:[#allocation2] sm:$0xff]  ;;  %s96_s18 = smov [#allocation5]   ;;  %vm26_vm0 = vcmask 982016  }
  0x13   :  { %v22_v1 = vmul.f32 0.5, %v21_v0  ;;  %s34_s19 = sshll.u32 %s96_s18, 4  ;;  %s35_s19 = int_to_ptr.vmem [resolvable:$true] %s34_s19 }
  0x14   :  { %s69_s20 = scalar_lea.vmem %s35_s19, 128  ;;  %p74_p9 = scmp.lt.s32.totalorder %s35_s19, %s35_s19 }
  0x15   :  { %45 = vtanh.f32 %v22_v1  ;;  %p70_p8 = scmp.ne.s32.totalorder %s35_s19, %s69_s20  ;;  %p75_p10 = scmp.lt.s32.totalorder %s69_s20, %s69_s20 }
  0x17   :  { %p76_p11 = por %p75_p10, %p74_p9 }
  0x19   :  { %p77_p12 = pnand %p76_p11, %p70_p8 }
  0x1f   :  { %v46_v2 = vpop.eup %45 }
  0x20   :  { %v24_v3 = vmul.f32 0.5, %v46_v2 }
  0x22   :  { %v25_v4 = vadd.f32 0.5, %v24_v3 }
  0x24   :  { %27 = vst.msk [vmem:[#allocation5] sm:$0xff] %vm26_vm0, %v25_v4 }
  0x25   :  { %80 = shalt.err (!%p77_p12)
}
  0x26   :  { %s81_s22 = scalar_lea.hbm %s132_s1, 128 }
  0x27   :  { %p82_p13 = scmp.ne.s32.totalorder %s132_s1, %s81_s22  ;;  %p85_p0 = scmp.lt.u32.totalorder %s81_s22, %s132_s1 }
  0x29   :  { %p87_p1 = pnand %p85_p0, %p82_p13 }
  0x2b   :  { %90 = shalt.err (!%p87_p1)
}
  0x2c   :  { %37 = dma.vmem_to_hbm [thread:$0]  %s35_s19, 128, %s132_s1, [#allocation4]  }
  0x2d   :  { %93 = dma.done.wait [#allocation4], 128  }
  0x2e   :  { %94 = vsyncadd [#allocation4], 4294967168 }
  0x2f   :  { %41 = vsyncpa [#allocation3], 1 }
  0x30   :  { %42 = vsyncpa [#allocation4], 1 }

</bundles_post_ra>
